<compile_context>
chip_gen: v7x
topology: tpu7x:2x2x1
jax: 0.10.0
libtpu: 0.0.40
codegen_flags: <defaults>
</compile_context>

<pallas_src>
import functools

import jax
import jax.numpy as jnp
from jax import lax
from jax.experimental import pallas as pl
from jax.experimental.pallas import tpu as pltpu


def _round_up(x, m):
    return ((x + m - 1) // m) * m


def _cdiv(a, b):
    return -(-a // b)


def _vmem_capacity_bytes():
    # Trace-time hardware query; fall back to the smallest per-core VMEM (v7x).
    try:
        return int(pltpu.get_tpu_info().vmem_capacity_bytes)
    except Exception:
        return 64 * 1024 * 1024


def _contrastive_loss_kernel(x0_ref, x1_ref, y_ref, out_ref, acc_ref, *,
                             margin, inv_two_b, batch, tiles_per_part):
    p = pl.program_id(0)          # part (TensorCore split) axis
    t = pl.program_id(1)          # reduction axis within this part
    tb = x0_ref.shape[0]

    @pl.when(t == 0)
    def _init():
        acc_ref[...] = jnp.zeros_like(acc_ref)

    # Upcast in-kernel; inputs arrive in their native dtype (halves HBM
    # traffic for bf16 inputs).
    x0 = x0_ref[...].astype(jnp.float32)          # (tb, D)
    x1 = x1_ref[...].astype(jnp.float32)          # (tb, D)
    y = y_ref[...].astype(jnp.float32)            # (tb, 1)

    diff = x0 - x1
    dist_sq = jnp.sum(diff * diff, axis=1, keepdims=True)   # (tb, 1) lane reduce
    dist = jnp.sqrt(dist_sq)
    mdist = jnp.maximum(margin - dist, 0.0)                  # clamp(min=0)
    per_pair = y * dist_sq + (1.0 - y) * (mdist * mdist)     # (tb, 1)

    # Row mask for the ragged tail: rows >= batch (partial / repeated edge
    # blocks) contribute exactly zero.  jnp.where also neutralizes any NaN/Inf
    # computed from out-of-bounds garbage.
    row = lax.broadcasted_iota(jnp.int32, (tb, 1), 0)
    global_row = (p * tiles_per_part + t) * tb + row
    per_pair = jnp.where(global_row < batch, per_pair, 0.0)

    # Vector accumulate; the reduce happens once at finalize.
    acc_ref[...] += per_pair

    @pl.when(t == pl.num_programs(1) - 1)
    def _finalize():
        # Single output store per part; /2/B folded into one multiply.
        out_ref[...] = jnp.sum(acc_ref[...], keepdims=True) * inv_two_b


def contrastive_loss(x0, x1, y, margin=1.0, *, num_parts=1,
                     max_block_rows=None):
    """x0, x1: (B, D) floats (any float dtype); y: (B,) labels. Returns scalar f32."""
    B, D = x0.shape
    itemsize = jnp.dtype(x0.dtype).itemsize

    # Sublane alignment per dtype packing: 8 rows (f32), 16 (bf16), 32 (int8/fp8).
    packing = max(1, 4 // itemsize)
    sublane = 8 * packing

    # VMEM accounting per row of tile (lane-padded layouts):
    d_pad = _round_up(D, 128)
    per_row_bytes = (
        2 * 2 * d_pad * itemsize   # x0, x1 blocks, double-buffered
        + 2 * 128 * 4              # y (tb,1) f32 blocks, lane-padded, double-buffered
        + 128 * 4                  # (tb,1) f32 accumulator scratch
        + 3 * d_pad * 4            # f32 upcast / diff temporaries headroom
    )

    cap = _vmem_capacity_bytes()                       # 64 MiB v7x, 128 MiB v5e/v6e
    vmem_limit = min(cap * 3 // 4, cap - (8 << 20))    # 48 MiB v7x, 96 MiB v5e/v6e
    budget = vmem_limit // 2                           # slack for compiler temps

    max_tb = max(sublane, (budget // per_row_bytes) // sublane * sublane)
    rows_per_part = _round_up(_cdiv(B, max(1, int(num_parts))), sublane)
    tb = min(max_tb, rows_per_part)
    if max_block_rows is not None:
        tb = min(tb, max(sublane, (int(max_block_rows) // sublane) * sublane))
    tb = max(sublane, (tb // sublane) * sublane)

    tiles = _cdiv(B, tb)
    num_parts = max(1, min(int(num_parts), tiles))
    tiles_per_part = _cdiv(tiles, num_parts)

    y2d = y.reshape(B, 1)

    kernel = functools.partial(
        _contrastive_loss_kernel,
        margin=float(margin),
        inv_two_b=float(0.5 / B),
        batch=B,
        tiles_per_part=tiles_per_part,
    )

    if num_parts * tiles_per_part == tiles:
        # Exact cover: every (p, t) maps to a distinct valid tile.
        row_map = lambda p, t, _tpp=tiles_per_part: (p * _tpp + t, 0)
    else:
        # Rectangular grid over-covers the tiles: clamp to the last valid tile
        # (the in-kernel row mask zeroes those rows' contribution).
        last = tiles - 1
        row_map = (lambda p, t, _tpp=tiles_per_part, _last=last:
                   (jnp.minimum(p * _tpp + t, _last), 0))

    partials = pl.pallas_call(
        kernel,
        out_shape=jax.ShapeDtypeStruct((num_parts, 1), jnp.float32),
        grid=(num_parts, tiles_per_part),
        in_specs=[
            pl.BlockSpec((tb, D), row_map),
            pl.BlockSpec((tb, D), row_map),
            pl.BlockSpec((tb, 1), row_map),
        ],
        out_specs=pl.BlockSpec((1, 1), lambda p, t: (p, 0)),
        scratch_shapes=[pltpu.VMEM((tb, 1), jnp.float32)],
        compiler_params=pltpu.CompilerParams(
            dimension_semantics=("parallel", "arbitrary"),
            vmem_limit_bytes=int(vmem_limit),
        ),
    )(x0, x1, y2d)

    return jnp.sum(partials)


def contrastive_loss_ref(x0, x1, y, margin=1.0):
    # Pure-JAX reference mirroring the PyTorch module, for verification.
    diff = x0.astype(jnp.float32) - x1.astype(jnp.float32)
    dist_sq = jnp.sum(diff ** 2, axis=1)
    dist = jnp.sqrt(dist_sq)
    mdist = jnp.maximum(margin - dist, 0.0)
    loss = y * dist_sq + (1.0 - y) * mdist ** 2
    return jnp.sum(loss) / 2.0 / x0.shape[0]


if __name__ == "__main__":
    key = jax.random.PRNGKey(0)
    k0, k1, ky = jax.random.split(key, 3)

    # 1) Small shapes consistent with (batch, hidden) pair embeddings.
    B, D = 8, 32
    x0 = jax.random.normal(k0, (B, D), dtype=jnp.float32)
    x1 = jax.random.normal(k1, (B, D), dtype=jnp.float32)
    y = jax.random.bernoulli(ky, 0.5, (B,)).astype(jnp.float32)

    loss = contrastive_loss(x0, x1, y, margin=1.0)
    jax.block_until_ready(loss)
    ref = contrastive_loss_ref(x0, x1, y, margin=1.0)
    assert jnp.allclose(loss, ref, rtol=1e-5, atol=1e-5), (loss, ref)

    # 2) Tiled path with a ragged tail handled by the in-kernel row mask
    #    (no padding of any input): tb=16 -> 3 tiles, last tile 8 valid rows.
    B2, D2 = 40, 128
    x0b = jax.random.normal(k0, (B2, D2), dtype=jnp.float32)
    x1b = jax.random.normal(k1, (B2, D2), dtype=jnp.float32)
    yb = jax.random.bernoulli(ky, 0.5, (B2,)).astype(jnp.float32)
    loss2 = contrastive_loss(x0b, x1b, yb, margin=1.0, max_block_rows=16)
    jax.block_until_ready(loss2)
    ref2 = contrastive_loss_ref(x0b, x1b, yb, margin=1.0)
    assert jnp.allclose(loss2, ref2, rtol=1e-5, atol=1e-5), (loss2, ref2)

    # 3) Opt-in 2-part split (v7x-style) with evenly divisible tiles:
    #    tb=16 -> 4 tiles -> 2 parts x 2 tiles, exercising per-part partials.
    B3, D3 = 64, 256
    x0c = jax.random.normal(k0, (B3, D3), dtype=jnp.float32)
    x1c = jax.random.normal(k1, (B3, D3), dtype=jnp.float32)
    yc = jax.random.bernoulli(ky, 0.5, (B3,)).astype(jnp.float32)
    loss3 = contrastive_loss(x0c, x1c, yc, margin=1.0, max_block_rows=16,
                             num_parts=2)
    jax.block_until_ready(loss3)
    ref3 = contrastive_loss_ref(x0c, x1c, yc, margin=1.0)
    assert jnp.allclose(loss3, ref3, rtol=1e-5, atol=1e-5), (loss3, ref3)

    print("KERNEL_OK")
</pallas_src>

<mosaic_0001>
module attributes {stable_mosaic.version = 11 : i64} {
  func.func @_contrastive_loss_kernel(%arg0: i32, %arg1: i32, %arg2: memref<8x32xf32, #tpu.memory_space<vmem>>, %arg3: memref<8x32xf32, #tpu.memory_space<vmem>>, %arg4: memref<8x1xf32, #tpu.memory_space<vmem>>, %arg5: memref<1x1xf32, #tpu.memory_space<vmem>>, %arg6: memref<8x1xf32, #tpu.memory_space<vmem>>) attributes {dimension_semantics = [#tpu.dimension_semantics<parallel>, #tpu.dimension_semantics<arbitrary>], iteration_bounds = array<i64: 1, 1>, scalar_prefetch = 0 : i64, scratch_operands = 1 : i64, tpu.core_type = #tpu.core_type<tc>, window_params = [{transform_indices = @transform_0, window_bounds = array<i64: 8, 32>}, {transform_indices = @transform_1, window_bounds = array<i64: 8, 32>}, {transform_indices = @transform_2, window_bounds = array<i64: 8, 1>}, {transform_indices = @transform_3, window_bounds = array<i64: 1, 1>}]} {
    %c0_i32 = arith.constant 0 : i32
    %0 = arith.cmpi eq, %arg1, %c0_i32 : i32
    %1 = arith.extui %0 : i1 to i32
    %c0_i32_0 = arith.constant 0 : i32
    %2 = arith.cmpi ne, %1, %c0_i32_0 : i32
    scf.if %2 {
      %cst_17 = arith.constant 0.000000e+00 : f32
      %37 = vector.broadcast %cst_17 : f32 to vector<8x1xf32>
      %c0_18 = arith.constant 0 : index
      %c0_19 = arith.constant 0 : index
      %38 = vector.load %arg6[%c0_18, %c0_19] : memref<8x1xf32, #tpu.memory_space<vmem>>, vector<8x1xf32>
      tpu.vector_store %arg6[%c0_18, %c0_19], %37 {strides = array<i32>} : memref<8x1xf32, #tpu.memory_space<vmem>>, vector<8x1xf32>,
    } else {
    }
    %c0 = arith.constant 0 : index
    %c0_1 = arith.constant 0 : index
    %3 = vector.load %arg2[%c0, %c0_1] : memref<8x32xf32, #tpu.memory_space<vmem>>, vector<8x32xf32>
    %c0_2 = arith.constant 0 : index
    %c0_3 = arith.constant 0 : index
    %4 = vector.load %arg3[%c0_2, %c0_3] : memref<8x32xf32, #tpu.memory_space<vmem>>, vector<8x32xf32>
    %c0_4 = arith.constant 0 : index
    %c0_5 = arith.constant 0 : index
    %5 = vector.load %arg4[%c0_4, %c0_5] : memref<8x1xf32, #tpu.memory_space<vmem>>, vector<8x1xf32>
    %6 = arith.subf %3, %4 : vector<8x32xf32>
    %7 = arith.mulf %6, %6 : vector<8x32xf32>
    %cst = arith.constant dense<0.000000e+00> : vector<8xf32>
    %8 = vector.multi_reduction <add>, %7, %cst [1] : vector<8x32xf32> to vector<8xf32>
    %9 = vector.shape_cast %8 : vector<8xf32> to vector<8x1xf32>
    %10 = math.sqrt %9 : vector<8x1xf32>
    %cst_6 = arith.constant 1.000000e+00 : f32
    %11 = vector.broadcast %cst_6 : f32 to vector<8x1xf32>
    %12 = arith.subf %11, %10 : vector<8x1xf32>
    %cst_7 = arith.constant 0.000000e+00 : f32
    %13 = vector.broadcast %cst_7 : f32 to vector<8x1xf32>
    %14 = arith.maximumf %12, %13 : vector<8x1xf32>
    %15 = arith.mulf %5, %9 : vector<8x1xf32>
    %cst_8 = arith.constant 1.000000e+00 : f32
    %16 = vector.broadcast %cst_8 : f32 to vector<8x1xf32>
    %17 = arith.subf %16, %5 : vector<8x1xf32>
    %18 = arith.mulf %14, %14 : vector<8x1xf32>
    %19 = arith.mulf %17, %18 : vector<8x1xf32>
    %20 = arith.addf %15, %19 : vector<8x1xf32>
    %21 = tpu.iota {dimensions = array<i32: 0>} : vector<8x1xi32>
    %c1_i32 = arith.constant 1 : i32
    %22 = arith.muli %arg0, %c1_i32 : i32
    %23 = arith.addi %22, %arg1 : i32
    %c8_i32 = arith.constant 8 : i32
    %24 = arith.muli %23, %c8_i32 : i32
    %25 = vector.broadcast %24 : i32 to vector<8x1xi32>
    %26 = arith.addi %25, %21 : vector<8x1xi32>
    %c8_i32_9 = arith.constant 8 : i32
    %27 = vector.broadcast %c8_i32_9 : i32 to vector<8x1xi32>
    %28 = arith.cmpi slt, %26, %27 : vector<8x1xi32>
    %cst_10 = arith.constant 0.000000e+00 : f32
    %29 = vector.broadcast %cst_10 : f32 to vector<8x1xf32>
    %30 = arith.select %28, %20, %29 : vector<8x1xi1>, vector<8x1xf32>
    %c0_11 = arith.constant 0 : index
    %c0_12 = arith.constant 0 : index
    %31 = vector.load %arg6[%c0_11, %c0_12] : memref<8x1xf32, #tpu.memory_space<vmem>>, vector<8x1xf32>
    %32 = arith.addf %31, %30 : vector<8x1xf32>
    %c0_13 = arith.constant 0 : index
    %c0_14 = arith.constant 0 : index
    %33 = vector.load %arg6[%c0_13, %c0_14] : memref<8x1xf32, #tpu.memory_space<vmem>>, vector<8x1xf32>
    tpu.vector_store %arg6[%c0_13, %c0_14], %32 {strides = array<i32>} : memref<8x1xf32, #tpu.memory_space<vmem>>, vector<8x1xf32>,
    %c0_i32_15 = arith.constant 0 : i32
    %34 = arith.cmpi eq, %arg1, %c0_i32_15 : i32
    %35 = arith.extui %34 : i1 to i32
    %c0_i32_16 = arith.constant 0 : i32
    %36 = arith.cmpi ne, %35, %c0_i32_16 : i32
    scf.if %36 {
      %c0_17 = arith.constant 0 : index
      %c0_18 = arith.constant 0 : index
      %37 = vector.load %arg6[%c0_17, %c0_18] : memref<8x1xf32, #tpu.memory_space<vmem>>, vector<8x1xf32>
      %38 = vector.shape_cast %37 : vector<8x1xf32> to vector<1x8x1xf32>
      %cst_19 = arith.constant dense<0.000000e+00> : vector<1xf32>
      %39 = vector.multi_reduction <add>, %38, %cst_19 [1, 2] : vector<1x8x1xf32> to vector<1xf32>
      %40 = vector.shape_cast %39 : vector<1xf32> to vector<1x1x1xf32>
      %41 = vector.extract %40[0, 0, 0] : f32 from vector<1x1x1xf32>
      %42 = vector.broadcast %41 : f32 to vector<1x1xf32>
      %cst_20 = arith.constant 6.250000e-02 : f32
      %43 = vector.broadcast %cst_20 : f32 to vector<1x1xf32>
      %44 = arith.mulf %42, %43 : vector<1x1xf32>
      %c0_21 = arith.constant 0 : index
      %c0_22 = arith.constant 0 : index
      %45 = vector.load %arg5[%c0_21, %c0_22] : memref<1x1xf32, #tpu.memory_space<vmem>>, vector<1x1xf32>
      tpu.vector_store %arg5[%c0_21, %c0_22], %44 {strides = array<i32>} : memref<1x1xf32, #tpu.memory_space<vmem>>, vector<1x1xf32>,
    } else {
    }
    return
  }
  func.func @transform_0(%arg0: i32, %arg1: i32) -> (i32, i32) {
    %c1_i32 = arith.constant 1 : i32
    %0 = arith.muli %arg0, %c1_i32 : i32
    %1 = arith.addi %0, %arg1 : i32
    %c0_i32 = arith.constant 0 : i32
    %c0_i32_0 = arith.constant 0 : i32
    return %1, %c0_i32 : i32, i32
  }
  func.func @transform_1(%arg0: i32, %arg1: i32) -> (i32, i32) {
    %c1_i32 = arith.constant 1 : i32
    %0 = arith.muli %arg0, %c1_i32 : i32
    %1 = arith.addi %0, %arg1 : i32
    %c0_i32 = arith.constant 0 : i32
    %c0_i32_0 = arith.constant 0 : i32
    return %1, %c0_i32 : i32, i32
  }
  func.func @transform_2(%arg0: i32, %arg1: i32) -> (i32, i32) {
    %c1_i32 = arith.constant 1 : i32
    %0 = arith.muli %arg0, %c1_i32 : i32
    %1 = arith.addi %0, %arg1 : i32
    %c0_i32 = arith.constant 0 : i32
    %c0_i32_0 = arith.constant 0 : i32
    return %1, %c0_i32 : i32, i32
  }
  func.func @transform_3(%arg0: i32, %arg1: i32) -> (i32, i32) {
    %c0_i32 = arith.constant 0 : i32
    %c0_i32_0 = arith.constant 0 : i32
    return %arg0, %c0_i32 : i32, i32
  }
}

</mosaic_0001>

<bundles_post_ra>
// kernel: tpu_custom_call.1
= control target key start
LH: loop header
LB: loop body
LE: loop exit
PB: predicated region body
PF: predicated region fallthrough
CT: control target
= control target key end

     0   :  { %8 = vsyncpa [#allocation4], 0  ;;  %s262_s0 = inlined_call_operand.vmem [shape: f32[8,32], index: 0, kind: input, shape index: {}]   ;;  %s263_s1 = inlined_call_operand.hbm [shape: f32[8,32], index: 1, kind: input, shape index: {}]   ;;  %s264_s2 = inlined_call_operand.vmem [shape: f32[8,1], index: 2, kind: input, shape index: {}]   ;;  %s265_s3 = inlined_call_operand.hbm [shape: f32[1,1], index: 3, kind: output, shape index: {}]  }
   0x1   :  { %9 = vsyncpa [#allocation5], 0  ;;  %s206_s12 = smov [#allocation3]   ;;  %s158_s16 = scalar_lea.hbm %s263_s1, 128 }
   0x2   :  { %s27_s13 = sshll.u32 %s206_s12, 4  ;;  %p159_p0 = scmp.ne.s32.totalorder %s263_s1, %s158_s16  ;;  %s28_s13 = int_to_ptr.vmem [resolvable:$true] %s27_s13 }
   0x3   :  { %p162_p1 = scmp.lt.u32.totalorder %s158_s16, %s263_s1 }
   0x5   :  { %p164_p2 = pnand %p162_p1, %p159_p0 }
   0x7   :  { %167 = shalt.err (!%p164_p2)
}
   0x8   :  { %s168_s21 = scalar_lea.vmem %s28_s13, 128  ;;  %p173_p4 = scmp.lt.s32.totalorder %s28_s13, %s28_s13 }
   0x9   :  { %p169_p3 = scmp.ne.s32.totalorder %s28_s13, %s168_s21  ;;  %p174_p5 = scmp.lt.s32.totalorder %s168_s21, %s168_s21 }
   0xb   :  { %p175_p6 = por %p174_p5, %p173_p4 }
   0xd   :  { %p176_p7 = pnand %p175_p6, %p169_p3 }
   0xf   :  { %179 = shalt.err (!%p176_p7)
}
  0x10   :  { %30 = dma.hbm_to_vmem [thread:$0]  %s263_s1, 128, %s28_s13, [#allocation4]  }
  0x11   :  { %202 = dma.done.wait [#allocation4], 128  }
  0x12   :  { %203 = vsyncadd [#allocation4], 4294967168  ;;  %v71_v0 = vld [vmem:[%s262_s0] sm:$0xff]  ;;  %v72_v1 = vld [vmem:[#allocation3] sm:$0xff]  ;;  %vm76_vm0 = vcmask 261120   ;;  %vm69_vm1 = vcmask 7168  }
  0x13   :  { %v74_v2 = vsub.f32 %v71_v0, %v72_v1  ;;  %v207_v5 = vmov 0.0   ;;  %v73_v13 = vld [vmem:[%s264_s2] sm:$0xff]  ;;  %s208_s2 = smov [#allocation6]   ;;  %vm122_vm4 = vcmask 0  }
  0x14   :  { %70 = vst.msk [vmem:[#allocation2] sm:$0xff] %vm69_vm1, %v207_v5  ;;  %v90_v14 = vsub.f32 1.0, %v73_v13  ;;  %s130_s26 = sshll.u32 %s208_s2, 4  ;;  %s131_s26 = int_to_ptr.vmem [resolvable:$true] %s130_s26 }
  0x15   :  { %v75_v3 = vmul.f32 %v74_v2, %v74_v2  ;;  %s180_s28 = scalar_lea.vmem %s131_s26, 16  ;;  %s184_s29 = scalar_lea.vmem %s131_s26, 32 }
  0x16   :  { %p181_p8 = scmp.ne.s32.totalorder %s131_s26, %s180_s28  ;;  %p185_p9 = scmp.lt.s32.totalorder %s131_s26, %s131_s26 }
  0x17   :  { %v77_v4 = vsel %vm76_vm0, %v75_v3, 0.0  ;;  %p186_p10 = scmp.lt.s32.totalorder %s184_s29, %s180_s28 }
  0x18   :  { %78 = vadd.xlane.f32.xlu0 %v77_v4 }
  0x19   :  { %p187_p11 = por %p186_p10, %p185_p9 }
  0x1b   :  { %v102_v19 = vld [vmem:[#allocation2] sm:$0xff]  ;;  %p188_p12 = pnand %p187_p11, %p181_p8 }
  0xa5   :  { %v79_v6 = vpop.xlane.xlu0 %78 }
  0xa6   :  { %156 = vrsqrt.f32 %v79_v6  ;;  %vm82_vm2 = vcmp.eq.f32.partialorder %v79_v6, inf  ;;  %v85_v9 = vand.u32 2147483648, %v79_v6  ;;  %vm84_vm3 = vcmp.eq.f32.partialorder %v79_v6, 0.0 }
  0xa7   :  { %v89_v17 = vmul.f32 %v79_v6, %v73_v13 }
  0xb0   :  { %v157_v7 = vpop.eup %156 }
  0xb1   :  { %v81_v8 = vmul.f32 %v157_v7, %v79_v6 }
  0xb3   :  { %v83_v10 = vsel %vm82_vm2, %v79_v6, %v81_v8 }
  0xb4   :  { %v86_v11 = vsel %vm84_vm3, %v85_v9, %v83_v10 }
  0xb5   :  { %v87_v12 = vsub.f32 1.0, %v86_v11 }
  0xb7   :  { %v88_v15 = vmax.f32 %v87_v12, 0.0 }
  0xb9   :  { %v91_v16 = vmul.f32 %v88_v15, %v88_v15 }
  0xbb   :  { %v92_v18 = vmul.f32 %v91_v16, %v90_v14 }
  0xbd   :  { %v93_v20 = vadd.f32 %v92_v18, %v89_v17 }
  0xbf   :  { %v103_v21 = vadd.f32 %v102_v19, %v93_v20 }
  0xc1   :  { %105 = vst.msk [vmem:[#allocation2] sm:$0xff] %vm69_vm1, %v103_v21 }
  0xc8   :  { %v109_v22 = vld [vmem:[#allocation2] sm:$0xff] }
  0xc9   :  { %v110_v23 = vsel %vm69_vm1, %v109_v22, 0.0 }
  0xca   :  { %111 = vadd.xlane.f32.xlu0 %v110_v23 }
 0x157   :  { %v112_v24 = vpop.xlane.xlu0 %111 }
 0x158   :  { %v113_v25 = vrot.slane %v112_v24, 4 }
 0x15a   :  { %v114_v26 = vadd.f32 %v113_v25, %v112_v24 }
 0x15c   :  { %v115_v27 = vrot.slane %v114_v26, 2 }
 0x15e   :  { %v116_v28 = vadd.f32 %v115_v27, %v114_v26 }
 0x160   :  { %v117_v29 = vrot.slane %v116_v28, 1 }
 0x162   :  { %v118_v30 = vadd.f32 %v117_v29, %v116_v28 }
 0x164   :  { %151 = vpush %v118_v30 }
 0x195   :  { %s152_s27 = spop %151 }
 0x196   :  { %v120_v31 = vstv %s152_s27 }
 0x197   :  { %v121_v32 = vmul.f32 0.0625, %v120_v31 }
 0x199   :  { %123 = vst.msk [vmem:[#allocation6] sm:$0x1] %vm122_vm4, %v121_v32 }
 0x19a   :  { %191 = shalt.err (!%p188_p12)
}
 0x19b   :  { %s192_s5 = scalar_lea.hbm %s265_s3, 16 }
 0x19c   :  { %p193_p13 = scmp.ne.s32.totalorder %s265_s3, %s192_s5  ;;  %p196_p0 = scmp.lt.u32.totalorder %s192_s5, %s265_s3 }
 0x19e   :  { %p198_p1 = pnand %p196_p0, %p193_p13 }
 0x1a0   :  { %201 = shalt.err (!%p198_p1)
}
 0x1a1   :  { %133 = dma.vmem_to_hbm [thread:$0]  %s131_s26, 16, %s265_s3, [#allocation5]  }
 0x1a2   :  { %204 = dma.done.wait [#allocation5], 16  }
 0x1a3   :  { %205 = vsyncadd [#allocation5], 4294967280 }
 0x1a4   :  { %137 = vsyncpa [#allocation4], 1 }
 0x1a5   :  { %138 = vsyncpa [#allocation5], 1 }

</bundles_post_ra>
